<compile_context>
chip_gen: v7x
topology: tpu7x:2x2x1
jax: 0.10.0
libtpu: 0.0.40
codegen_flags: <defaults>
</compile_context>

<pallas_src>
import functools

import jax
import jax.numpy as jnp
from jax.experimental import pallas as pl
from jax.experimental.pallas import tpu as pltpu


def _round_up(x, m):
    return (x + m - 1) // m * m


_VMEM_CAP_BYTES = 48 * 1024 * 1024  # headroom under v7x's 64 MiB/TC physical VMEM


def _is_v5e():
    try:
        kind = jax.devices()[0].device_kind.lower()
    except Exception:
        return False
    return ("v5 lite" in kind) or ("v5e" in kind) or ("v5lite" in kind)


def _prefer_fused_matmul(k_pad):
    # One full-K (<=256) matmul with 4*H lanes beats two half-filled K=128 passes
    # with 3*H lanes on the 256-deep v6e/v7x MXUs; v5e's MXU is only 128 deep so
    # the extra 4/3 lane work doesn't pay there, and large K fills both forms.
    return (not _is_v5e()) and k_pad <= 256


def _const_block_spec(shape):
    """Grid-invariant BlockSpec: constant index_map, single-buffered when supported."""
    index_map = lambda b: (0,) * len(shape)
    try:
        return pl.BlockSpec(shape, index_map, pipeline_mode=pl.Buffered(1))
    except TypeError:  # older jax without pipeline_mode: default buffering
        return pl.BlockSpec(shape, index_map)


def _choose_tile_and_vmem(B, I_pad, H_pad, weight_bytes, gate_cols):
    """Pick batch tile TB, padded batch B_pad and a computed vmem limit."""
    B8 = _round_up(max(B, 1), 8)

    def footprint(tb):
        acts = tb * I_pad * 4 * 2           # x tile (worst case f32), double-buffered
        acts += tb * H_pad * 4 * 2 * 2      # h + out tiles (f32), double-buffered
        temps = tb * gate_cols * H_pad * 4 * 3  # f32 gate temporaries (upper bound)
        return weight_bytes + acts + temps

    if B8 <= 16:
        TB = B8
    else:
        # >=2 tiles so v7x's two TensorCores both get work; ~256-row tiles sized
        # from B itself so B_pad - B stays small (no flat 256 cap / 2x waste).
        n_tiles = max(2, pl.cdiv(B8, 256))
        TB = _round_up(pl.cdiv(B8, n_tiles), 8)
    while TB > 8 and footprint(TB) > _VMEM_CAP_BYTES:
        TB = _round_up(TB // 2, 8)
    B_pad = _round_up(B8, TB)
    vmem_limit = min(_VMEM_CAP_BYTES, int(footprint(TB) * 1.25) + (4 << 20))
    return TB, B_pad, vmem_limit


def _prep_activations(x, h, B, B_pad, I_pad, H_pad, input_size, hidden_size):
    """Pad only when necessary; aligned inputs go straight to the kernel (the bf16
    cast of matmul operands happens in-kernel, avoiding a wrapper-side HBM pass)."""
    if B_pad != B or I_pad != input_size:
        x_in = (jnp.zeros((B_pad, I_pad), jnp.bfloat16)
                .at[:B, :input_size].set(x.astype(jnp.bfloat16)))
    else:
        x_in = x
    if B_pad != B or H_pad != hidden_size:
        h_in = (jnp.zeros((B_pad, H_pad), jnp.float32)
                .at[:B, :hidden_size].set(h.astype(jnp.float32)))
    else:
        h_in = h.astype(jnp.float32)
    return x_in, h_in


# --------------------------------------------------------------------------- #
# Kernels
# --------------------------------------------------------------------------- #
def _gru_cell_fused_kernel(x_ref, h_ref, w_ref, b_ref, out_ref, *, hidden_pad):
    """Single-matmul GRUCell (fills the 256-deep v6e/v7x MXU in one pass).

    x_ref:   (TB, I_pad)             bf16 or f32 (cast in-kernel)
    h_ref:   (TB, H_pad)             f32 (also feeds the z*h state carry)
    w_ref:   (I_pad+H_pad, 4*H_pad)  bf16, columns [r | z | n_i | n_h]
    b_ref:   (1, 4*H_pad)            f32, [b_ir+b_hr | b_iz+b_hz | b_in | b_hn]
    out_ref: (TB, H_pad)             f32
    """
    H = hidden_pad
    h = h_ref[...]                                                   # f32 state
    xh = jnp.concatenate(
        [x_ref[...].astype(jnp.bfloat16), h.astype(jnp.bfloat16)], axis=-1)
    g = jnp.dot(xh, w_ref[...], preferred_element_type=jnp.float32) + b_ref[...]

    # Static lane-aligned slices (H_pad is a multiple of 128). Gate math in f32
    # (works on v5e's f32-only VPU/EUP too).
    # TODO(synk): on v6e/v7x the sigmoid/tanh could run in bf16 to halve EUP pressure.
    r = jax.nn.sigmoid(g[:, 0:H])
    z = jax.nn.sigmoid(g[:, H:2 * H])
    n = jnp.tanh(g[:, 2 * H:3 * H] + r * g[:, 3 * H:4 * H])
    out_ref[...] = ((1.0 - z) * n + z * h).astype(out_ref.dtype)


def _gru_cell_split_kernel(x_ref, h_ref, wih_ref, whh_ref, b_rzn_ref, b_hn_ref,
                           out_ref, *, hidden_pad):
    """Two-matmul GRUCell (v5e 128-deep MXU, or large K). Gate order r, z, n."""
    H = hidden_pad
    h = h_ref[...]
    gi = jnp.dot(x_ref[...].astype(jnp.bfloat16), wih_ref[...],
                 preferred_element_type=jnp.float32) + b_rzn_ref[...]
    gh = jnp.dot(h.astype(jnp.bfloat16), whh_ref[...],
                 preferred_element_type=jnp.float32)
    r = jax.nn.sigmoid(gi[:, 0:H] + gh[:, 0:H])
    z = jax.nn.sigmoid(gi[:, H:2 * H] + gh[:, H:2 * H])
    n = jnp.tanh(gi[:, 2 * H:3 * H] + r * (gh[:, 2 * H:3 * H] + b_hn_ref[...]))
    out_ref[...] = ((1.0 - z) * n + z * h).astype(out_ref.dtype)


# --------------------------------------------------------------------------- #
# pallas_call wrappers
# --------------------------------------------------------------------------- #
@functools.partial(jax.jit, static_argnames=("input_size", "hidden_size"))
def gru_cell_fused_pallas(x, h, w_packed, b_packed, *, input_size, hidden_size):
    B = x.shape[0]
    K_pad, H4 = w_packed.shape
    H_pad = H4 // 4
    I_pad = K_pad - H_pad

    weight_bytes = K_pad * H4 * 2 + H4 * 4
    TB, B_pad, vmem_limit = _choose_tile_and_vmem(B, I_pad, H_pad, weight_bytes, 4)
    x_in, h_in = _prep_activations(x, h, B, B_pad, I_pad, H_pad,
                                   input_size, hidden_size)

    kernel = functools.partial(_gru_cell_fused_kernel, hidden_pad=H_pad)
    out = pl.pallas_call(
        kernel,
        out_shape=jax.ShapeDtypeStruct((B_pad, H_pad), jnp.float32),
        grid=(B_pad // TB,),
        in_specs=[
            pl.BlockSpec((TB, I_pad), lambda b: (b, 0)),   # x tile per grid step
            pl.BlockSpec((TB, H_pad), lambda b: (b, 0)),   # h tile per grid step
            _const_block_spec((K_pad, H4)),                # packed weights (resident)
            _const_block_spec((1, H4)),                    # packed biases (resident)
        ],
        out_specs=pl.BlockSpec((TB, H_pad), lambda b: (b, 0)),
        compiler_params=pltpu.CompilerParams(
            dimension_semantics=("parallel",),             # shard batch tiles across TCs
            vmem_limit_bytes=vmem_limit,
        ),
    )(x_in, h_in, w_packed, b_packed)

    if B_pad != B or H_pad != hidden_size:
        out = out[:B, :hidden_size]
    return out.astype(x.dtype)


@functools.partial(jax.jit, static_argnames=("input_size", "hidden_size"))
def gru_cell_split_pallas(x, h, w_ih_packed, w_hh_packed, b_rzn, b_hn,
                          *, input_size, hidden_size):
    B = x.shape[0]
    I_pad = w_ih_packed.shape[0]
    H_pad = w_hh_packed.shape[0]
    H3 = w_ih_packed.shape[1]

    weight_bytes = (I_pad + H_pad) * H3 * 2 + H3 * 4 + H_pad * 4
    TB, B_pad, vmem_limit = _choose_tile_and_vmem(B, I_pad, H_pad, weight_bytes, 3)
    x_in, h_in = _prep_activations(x, h, B, B_pad, I_pad, H_pad,
                                   input_size, hidden_size)

    kernel = functools.partial(_gru_cell_split_kernel, hidden_pad=H_pad)
    out = pl.pallas_call(
        kernel,
        out_shape=jax.ShapeDtypeStruct((B_pad, H_pad), jnp.float32),
        grid=(B_pad // TB,),
        in_specs=[
            pl.BlockSpec((TB, I_pad), lambda b: (b, 0)),
            pl.BlockSpec((TB, H_pad), lambda b: (b, 0)),
            _const_block_spec((I_pad, H3)),
            _const_block_spec((H_pad, H3)),
            _const_block_spec((1, H3)),
            _const_block_spec((1, H_pad)),
        ],
        out_specs=pl.BlockSpec((TB, H_pad), lambda b: (b, 0)),
        compiler_params=pltpu.CompilerParams(
            dimension_semantics=("parallel",),
            vmem_limit_bytes=vmem_limit,
        ),
    )(x_in, h_in, w_ih_packed, w_hh_packed, b_rzn, b_hn)

    if B_pad != B or H_pad != hidden_size:
        out = out[:B, :hidden_size]
    return out.astype(x.dtype)


# --------------------------------------------------------------------------- #
# Module wrappers
# --------------------------------------------------------------------------- #
class PallasGRUCell:
    """Deterministically-initialized GRUCell whose forward is the Pallas kernel."""

    def __init__(self, input_size, hidden_size, key):
        self.input_size = input_size
        self.hidden_size = hidden_size
        k = 1.0 / jnp.sqrt(hidden_size)
        k1, k2, k3, k4 = jax.random.split(key, 4)

        # f32 "torch-layout" parameters (gate order r, z, n), kept for reference math.
        self.w_ih = jax.random.uniform(k1, (3, input_size, hidden_size), jnp.float32, -k, k)
        self.w_hh = jax.random.uniform(k2, (3, hidden_size, hidden_size), jnp.float32, -k, k)
        self.b_ih = jax.random.uniform(k3, (3, hidden_size), jnp.float32, -k, k)
        self.b_hh = jax.random.uniform(k4, (3, hidden_size), jnp.float32, -k, k)

        I_pad = _round_up(input_size, 128)
        H_pad = _round_up(hidden_size, 128)
        K_pad = I_pad + H_pad
        self._use_fused = _prefer_fused_matmul(K_pad)

        def pad_h(v):
            return jnp.zeros((H_pad,), jnp.float32).at[:hidden_size].set(v)

        if self._use_fused:
            # One packed weight: rows [x | h], columns [r | z | n_i | n_h].
            w = jnp.zeros((K_pad, 4 * H_pad), jnp.float32)
            w = w.at[:input_size, 0:hidden_size].set(self.w_ih[0])
            w = w.at[:input_size, H_pad:H_pad + hidden_size].set(self.w_ih[1])
            w = w.at[:input_size, 2 * H_pad:2 * H_pad + hidden_size].set(self.w_ih[2])
            w = w.at[I_pad:I_pad + hidden_size, 0:hidden_size].set(self.w_hh[0])
            w = w.at[I_pad:I_pad + hidden_size, H_pad:H_pad + hidden_size].set(self.w_hh[1])
            w = w.at[I_pad:I_pad + hidden_size, 3 * H_pad:3 * H_pad + hidden_size].set(self.w_hh[2])
            self._w_packed = w.astype(jnp.bfloat16)                   # (K_pad, 4*H_pad)
            self._b_packed = jnp.concatenate([
                pad_h(self.b_ih[0] + self.b_hh[0]),
                pad_h(self.b_ih[1] + self.b_hh[1]),
                pad_h(self.b_ih[2]),
                pad_h(self.b_hh[2]),
            ])[None, :]                                               # (1, 4*H_pad) f32
        else:
            def pack_w(wg, in_dim, in_pad):
                w_pad = jnp.zeros((3, in_pad, H_pad), jnp.float32)
                w_pad = w_pad.at[:, :in_dim, :hidden_size].set(wg)
                return jnp.concatenate([w_pad[0], w_pad[1], w_pad[2]],
                                       axis=-1).astype(jnp.bfloat16)

            self._w_ih_packed = pack_w(self.w_ih, input_size, I_pad)   # (I_pad, 3*H_pad)
            self._w_hh_packed = pack_w(self.w_hh, hidden_size, H_pad)  # (H_pad, 3*H_pad)
            self._b_rzn = jnp.concatenate([
                pad_h(self.b_ih[0] + self.b_hh[0]),
                pad_h(self.b_ih[1] + self.b_hh[1]),
                pad_h(self.b_ih[2]),
            ])[None, :]                                                # (1, 3*H_pad)
            self._b_hn = pad_h(self.b_hh[2])[None, :]                  # (1, H_pad)

    def __call__(self, x, h):
        # TODO(synk): if this cell is driven over a time sequence, move the time loop
        # inside the kernel (weights in VMEM scratch, h carried in an accumulator)
        # to amortize the weight DMA; or at least alias h in-place across calls.
        if self._use_fused:
            return gru_cell_fused_pallas(
                x, h, self._w_packed, self._b_packed,
                input_size=self.input_size, hidden_size=self.hidden_size)
        return gru_cell_split_pallas(
            x, h, self._w_ih_packed, self._w_hh_packed, self._b_rzn, self._b_hn,
            input_size=self.input_size, hidden_size=self.hidden_size)


class TensorDictModule:
    """Minimal JAX port of torchrl's TensorDictModule forward semantics.

    Reads `in_keys` from a dict-like tensordict, calls the wrapped module,
    and writes the outputs under `out_keys` into the same dict.
    # TODO(synk): `safe=True` spec projection (TensorSpec.project) and functorch/vmap
    # functional-call paths are torchrl bookkeeping with no Pallas compute; omitted.
    """

    def __init__(self, module, in_keys, out_keys, spec=None, safe=False):
        if not out_keys:
            raise RuntimeError("out_keys were not passed to TensorDictModule")
        if not in_keys:
            raise RuntimeError("in_keys were not passed to TensorDictModule")
        if isinstance(in_keys, str) or any(not isinstance(k, str) for k in in_keys):
            raise TypeError(f"Expected a list of strings but got: {in_keys}")
        if isinstance(out_keys, str) or any(not isinstance(k, str) for k in out_keys):
            raise TypeError(f"Expected a list of strings but got: {out_keys}")
        self.module = module
        self.in_keys = list(in_keys)
        self.out_keys = list(out_keys)
        self.spec = spec
        self.safe = safe

    def __call__(self, tensordict, tensordict_out=None):
        tensors = tuple(tensordict.get(k, None) for k in self.in_keys)
        out = self.module(*tensors)
        if not isinstance(out, tuple):
            out = (out,)
        if tensordict_out is None:
            tensordict_out = tensordict
        for key, tensor in zip(self.out_keys, out):
            tensordict_out[key] = tensor
        return tensordict_out


def _gru_reference(x, h, w_ih, w_hh, b_ih, b_hh):
    """Pure-JAX f32 reference for correctness checking (torch.nn.GRUCell math)."""
    gi = jnp.einsum("bi,gih->gbh", x, w_ih) + b_ih[:, None, :]
    gh = jnp.einsum("bh,ghk->gbk", h, w_hh) + b_hh[:, None, :]
    r = jax.nn.sigmoid(gi[0] + gh[0])
    z = jax.nn.sigmoid(gi[1] + gh[1])
    n = jnp.tanh(gi[2] + r * gh[2])
    return (1.0 - z) * n + z * h


if __name__ == "__main__":
    key = jax.random.PRNGKey(0)
    k_in, k_hid, k_mod = jax.random.split(key, 3)

    batch, input_size, hidden_size = 8, 16, 32

    td = {
        "input": jax.random.normal(k_in, (batch, input_size), jnp.float32),
        "hidden": jax.random.normal(k_hid, (batch, hidden_size), jnp.float32),
    }

    gru = PallasGRUCell(input_size, hidden_size, k_mod)
    td_module = TensorDictModule(
        module=gru, in_keys=["input", "hidden"], out_keys=["output"]
    )

    td_out = td_module(td)
    out = jax.block_until_ready(td_out["output"])
    assert out.shape == (batch, hidden_size)
    assert out.dtype == jnp.float32

    ref = _gru_reference(
        td["input"], td["hidden"], gru.w_ih, gru.w_hh, gru.b_ih, gru.b_hh
    )
    # bf16 matmul operands (f32 accumulation) -> loosened tolerance vs pure-f32 reference.
    assert jnp.allclose(out, ref, atol=2e-2, rtol=2e-2), float(jnp.max(jnp.abs(out - ref)))

    print("KERNEL_OK")
</pallas_src>

<mosaic_0001>
module attributes {stable_mosaic.version = 11 : i64} {
  func.func @_gru_cell_fused_kernel(%arg0: i32, %arg1: memref<8x128xbf16, #tpu.memory_space<vmem>>, %arg2: memref<8x128xf32, #tpu.memory_space<vmem>>, %arg3: memref<256x512xbf16, #tpu.memory_space<vmem>>, %arg4: memref<1x512xf32, #tpu.memory_space<vmem>>, %arg5: memref<8x128xf32, #tpu.memory_space<vmem>>) attributes {dimension_semantics = [#tpu.dimension_semantics<parallel>], iteration_bounds = array<i64: 1>, scalar_prefetch = 0 : i64, scratch_operands = 0 : i64, tpu.core_type = #tpu.core_type<tc>, window_params = [{transform_indices = @transform_0, window_bounds = array<i64: 8, 128>}, {transform_indices = @transform_1, window_bounds = array<i64: 8, 128>}, {pipeline_mode = #tpu.pipeline_mode<synchronous>, transform_indices = @transform_2, window_bounds = array<i64: 256, 512>}, {pipeline_mode = #tpu.pipeline_mode<synchronous>, transform_indices = @transform_3, window_bounds = array<i64: 1, 512>}, {transform_indices = @transform_4, window_bounds = array<i64: 8, 128>}]} {
    %c0 = arith.constant 0 : index
    %c0_0 = arith.constant 0 : index
    %0 = vector.load %arg2[%c0, %c0_0] : memref<8x128xf32, #tpu.memory_space<vmem>>, vector<8x128xf32>
    %c0_1 = arith.constant 0 : index
    %c0_2 = arith.constant 0 : index
    %1 = vector.load %arg1[%c0_1, %c0_2] : memref<8x128xbf16, #tpu.memory_space<vmem>>, vector<8x128xbf16>
    %2 = arith.truncf %0 : vector<8x128xf32> to vector<8x128xbf16>
    %3 = tpu.concatenate %1, %2 in 1 : vector<8x128xbf16>, vector<8x128xbf16> -> vector<8x256xbf16>
    %c0_3 = arith.constant 0 : index
    %c0_4 = arith.constant 0 : index
    %4 = vector.load %arg3[%c0_3, %c0_4] : memref<256x512xbf16, #tpu.memory_space<vmem>>, vector<256x512xbf16>
    %cst = arith.constant dense<0.000000e+00> : vector<8x512xf32>
    %5 = tpu.matmul %3, %4, %cst {dimension_numbers = #tpu.dot_dimension_numbers<[1], [0], [0], [1], [0, 0, 1, 1], [], []>} : vector<8x256xbf16>, vector<256x512xbf16>, vector<8x512xf32> -> vector<8x512xf32>
    %c0_5 = arith.constant 0 : index
    %c0_6 = arith.constant 0 : index
    %6 = vector.load %arg4[%c0_5, %c0_6] : memref<1x512xf32, #tpu.memory_space<vmem>>, vector<1x512xf32>
    %7 = vector.broadcast %6 : vector<1x512xf32> to vector<8x512xf32>
    %8 = arith.addf %5, %7 : vector<8x512xf32>
    %9 = vector.extract_strided_slice %8 {offsets = [0, 0], sizes = [8, 128], strides = [1, 1]} : vector<8x512xf32> to vector<8x128xf32>
    %10 = arith.negf %9 : vector<8x128xf32>
    %11 = math.exp %10 : vector<8x128xf32>
    %cst_7 = arith.constant 1.000000e+00 : f32
    %12 = vector.broadcast %cst_7 : f32 to vector<8x128xf32>
    %13 = arith.addf %12, %11 : vector<8x128xf32>
    %14 = arith.divf %12, %13 : vector<8x128xf32>
    %15 = vector.extract_strided_slice %8 {offsets = [0, 128], sizes = [8, 128], strides = [1, 1]} : vector<8x512xf32> to vector<8x128xf32>
    %16 = arith.negf %15 : vector<8x128xf32>
    %17 = math.exp %16 : vector<8x128xf32>
    %cst_8 = arith.constant 1.000000e+00 : f32
    %18 = vector.broadcast %cst_8 : f32 to vector<8x128xf32>
    %19 = arith.addf %18, %17 : vector<8x128xf32>
    %20 = arith.divf %18, %19 : vector<8x128xf32>
    %21 = vector.extract_strided_slice %8 {offsets = [0, 256], sizes = [8, 128], strides = [1, 1]} : vector<8x512xf32> to vector<8x128xf32>
    %22 = vector.extract_strided_slice %8 {offsets = [0, 384], sizes = [8, 128], strides = [1, 1]} : vector<8x512xf32> to vector<8x128xf32>
    %23 = arith.mulf %14, %22 : vector<8x128xf32>
    %24 = arith.addf %21, %23 : vector<8x128xf32>
    %25 = math.tanh %24 : vector<8x128xf32>
    %cst_9 = arith.constant 1.000000e+00 : f32
    %26 = vector.broadcast %cst_9 : f32 to vector<8x128xf32>
    %27 = arith.subf %26, %20 : vector<8x128xf32>
    %28 = arith.mulf %27, %25 : vector<8x128xf32>
    %29 = arith.mulf %20, %0 : vector<8x128xf32>
    %30 = arith.addf %28, %29 : vector<8x128xf32>
    %c0_10 = arith.constant 0 : index
    %c0_11 = arith.constant 0 : index
    %31 = vector.load %arg5[%c0_10, %c0_11] : memref<8x128xf32, #tpu.memory_space<vmem>>, vector<8x128xf32>
    tpu.vector_store %arg5[%c0_10, %c0_11], %30 {strides = array<i32>} : memref<8x128xf32, #tpu.memory_space<vmem>>, vector<8x128xf32>,
    return
  }
  func.func @transform_0(%arg0: i32) -> (i32, i32) {
    %c0_i32 = arith.constant 0 : i32
    %c0_i32_0 = arith.constant 0 : i32
    return %arg0, %c0_i32 : i32, i32
  }
  func.func @transform_1(%arg0: i32) -> (i32, i32) {
    %c0_i32 = arith.constant 0 : i32
    %c0_i32_0 = arith.constant 0 : i32
    return %arg0, %c0_i32 : i32, i32
  }
  func.func @transform_2(%arg0: i32) -> (i32, i32) {
    %c0_i32 = arith.constant 0 : i32
    %c0_i32_0 = arith.constant 0 : i32
    %c0_i32_1 = arith.constant 0 : i32
    return %c0_i32, %c0_i32_0 : i32, i32
  }
  func.func @transform_3(%arg0: i32) -> (i32, i32) {
    %c0_i32 = arith.constant 0 : i32
    %c0_i32_0 = arith.constant 0 : i32
    %c0_i32_1 = arith.constant 0 : i32
    return %c0_i32, %c0_i32_0 : i32, i32
  }
  func.func @transform_4(%arg0: i32) -> (i32, i32) {
    %c0_i32 = arith.constant 0 : i32
    %c0_i32_0 = arith.constant 0 : i32
    return %arg0, %c0_i32 : i32, i32
  }
}

</mosaic_0001>

<bundles_post_ra>
// kernel: gru_cell_fused_pallas.1
= control target key start
LH: loop header
LB: loop body
LE: loop exit
PB: predicated region body
PF: predicated region fallthrough
CT: control target
= control target key end

     0   :  { %9 = vsyncpa [#allocation3], 0  ;;  %s849_s0 = inlined_call_operand.vmem [shape: bf16[8,128], index: 0, kind: input, shape index: {}]   ;;  %s850_s1 = inlined_call_operand.vmem [shape: f32[8,128], index: 1, kind: input, shape index: {}]   ;;  %s851_s2 = inlined_call_operand.hbm [shape: bf16[256,512], index: 2, kind: input, shape index: {}]   ;;  %s852_s3 = inlined_call_operand.vmem [shape: f32[1,512], index: 3, kind: input, shape index: {}]   ;;  %s853_s4 = inlined_call_operand.hbm [shape: f32[8,128], index: 4, kind: output, shape index: {}]  }
   0x1   :  { %10 = vsyncpa [#allocation4], 0  ;;  %s782_s15 = smov [#allocation2]   ;;  %s734_s19 = scalar_lea.hbm %s851_s2, 8192 }
   0x2   :  { %s20_s16 = sshll.u32 %s782_s15, 4  ;;  %p735_p0 = scmp.ne.s32.totalorder %s851_s2, %s734_s19  ;;  %s21_s16 = int_to_ptr.vmem [resolvable:$true] %s20_s16 }
   0x3   :  { %p738_p1 = scmp.lt.u32.totalorder %s734_s19, %s851_s2 }
   0x5   :  { %p740_p2 = pnand %p738_p1, %p735_p0 }
   0x7   :  { %743 = shalt.err (!%p740_p2)
}
   0x8   :  { %s744_s24 = scalar_lea.vmem %s21_s16, 8192  ;;  %p749_p4 = scmp.lt.s32.totalorder %s21_s16, %s21_s16 }
   0x9   :  { %p745_p3 = scmp.ne.s32.totalorder %s21_s16, %s744_s24  ;;  %p750_p5 = scmp.lt.s32.totalorder %s744_s24, %s744_s24 }
   0xb   :  { %p751_p6 = por %p750_p5, %p749_p4 }
   0xd   :  { %p752_p7 = pnand %p751_p6, %p745_p3 }
   0xf   :  { %755 = shalt.err (!%p752_p7)
}
  0x10   :  { %s783_s25 = smov 256   ;;  %s784_s26 = smov 16  }
  0x11   :  { %26 = dma.hbm_to_vmem [thread:$0]  %s851_s2, 8192, %s21_s16, [#allocation3], %s783_s25, %s783_s25, %s784_s26  }
  0x12   :  { %778 = dma.done.wait [#allocation3], 8192  }
  0x13   :  { %779 = vsyncadd [#allocation3], 4294959104  ;;  %v628_v0 = vld [vmem:[#allocation2 + $0x4] ss:$16 sps:$4 sm:$0xff]   ;;  %v630_v1 = vld [vmem:[#allocation2] ss:$16 sps:$4 sm:$0xff]  }
  0x14   :  { %441 = vmatprep.subr.bf16.mxu0 %v628_v0  ;;  %v631_v2 = vld [vmem:[#allocation2 + $0x24] ss:$16 sps:$4 sm:$0xff]   ;;  %v633_v3 = vld [vmem:[#allocation2 + $0x20] ss:$16 sps:$4 sm:$0xff]   ;;  %v646_v7 = vld [vmem:[#allocation2 + $0xc] ss:$16 sps:$4 sm:$0xff]  }
  0x15   :  { %442 = vmatpush1.bf16.msra.mxu0 %v630_v1  ;;  %v634_v4 = vld [vmem:[#allocation2 + $0x44] ss:$16 sps:$4 sm:$0xff]   ;;  %v636_v5 = vld [vmem:[#allocation2 + $0x40] ss:$16 sps:$4 sm:$0xff]   ;;  %v648_v8 = vld [vmem:[#allocation2 + $0x8] ss:$16 sps:$4 sm:$0xff]   ;;  %482 = vmatprep.subr.bf16.mxu1 %v646_v7 }
  0x16   :  { %443 = vmatprep.subr.bf16.mxu0 %v631_v2  ;;  %v637_v6 = vld [vmem:[#allocation2 + $0x64] ss:$16 sps:$4 sm:$0xff]   ;;  %v639_v9 = vld [vmem:[#allocation2 + $0x60] ss:$16 sps:$4 sm:$0xff]   ;;  %483 = vmatpush1.bf16.msra.mxu1 %v648_v8  ;;  %v652_v10 = vld [vmem:[#allocation2 + $0x2c] ss:$16 sps:$4 sm:$0xff]  }
  0x17   :  { %v654_v11 = vld [vmem:[#allocation2 + $0x28] ss:$16 sps:$4 sm:$0xff]   ;;  %v640_v12 = vld [vmem:[#allocation2 + $0x84] ss:$16 sps:$4 sm:$0xff]   ;;  %484 = vmatprep.subr.bf16.mxu1 %v652_v10  ;;  %v642_v13 = vld [vmem:[#allocation2 + $0x80] ss:$16 sps:$4 sm:$0xff]  }
  0x18   :  { %v658_v14 = vld [vmem:[#allocation2 + $0x4c] ss:$16 sps:$4 sm:$0xff]   ;;  %v643_v15 = vld [vmem:[#allocation2 + $0xa4] ss:$16 sps:$4 sm:$0xff]   ;;  %v660_v16 = vld [vmem:[#allocation2 + $0x48] ss:$16 sps:$4 sm:$0xff]  }
  0x19   :  { %444 = vmatpush1.bf16.msra.mxu0 %v633_v3  ;;  %v664_v17 = vld [vmem:[#allocation2 + $0x6c] ss:$16 sps:$4 sm:$0xff]   ;;  %v645_v18 = vld [vmem:[#allocation2 + $0xa0] ss:$16 sps:$4 sm:$0xff]   ;;  %v649_v19 = vld [vmem:[#allocation2 + $0xc4] ss:$16 sps:$4 sm:$0xff]   ;;  %v101_v3 = vlaneseq }
  0x1a   :  { %445 = vmatprep.subr.bf16.mxu0 %v634_v4  ;;  %485 = vmatpush1.bf16.msra.mxu1 %v654_v11  ;;  %v666_v20 = vld [vmem:[#allocation2 + $0x68] ss:$16 sps:$4 sm:$0xff]   ;;  %v670_v21 = vld [vmem:[#allocation2 + $0x8c] ss:$16 sps:$4 sm:$0xff]   ;;  %v651_v22 = vld [vmem:[#allocation2 + $0xc0] ss:$16 sps:$4 sm:$0xff]  }
  0x1b   :  { %486 = vmatprep.subr.bf16.mxu1 %v658_v14  ;;  %v655_v23 = vld [vmem:[#allocation2 + $0xe4] ss:$16 sps:$4 sm:$0xff]   ;;  %v672_v24 = vld [vmem:[#allocation2 + $0x88] ss:$16 sps:$4 sm:$0xff]   ;;  %v676_v25 = vld [vmem:[#allocation2 + $0xac] ss:$16 sps:$4 sm:$0xff]  }
  0x1c   :  { %v657_v26 = vld [vmem:[#allocation2 + $0xe0] ss:$16 sps:$4 sm:$0xff]   ;;  %v661_v27 = vld [vmem:[#allocation2 + $0x104] ss:$16 sps:$4 sm:$0xff]   ;;  %v678_v28 = vld [vmem:[#allocation2 + $0xa8] ss:$16 sps:$4 sm:$0xff]  }
  0x1d   :  { %446 = vmatpush1.bf16.msra.mxu0 %v636_v5  ;;  %v682_v29 = vld [vmem:[#allocation2 + $0xcc] ss:$16 sps:$4 sm:$0xff]   ;;  %v663_v30 = vld [vmem:[#allocation2 + $0x100] ss:$16 sps:$4 sm:$0xff]   ;;  %v667_v31 = vld [vmem:[#allocation2 + $0x124] ss:$16 sps:$4 sm:$0xff]  }
  0x1e   :  { %447 = vmatprep.subr.bf16.mxu0 %v637_v6  ;;  %487 = vmatpush1.bf16.msra.mxu1 %v660_v16  ;;  %v684_v32 = vld [vmem:[#allocation2 + $0xc8] ss:$16 sps:$4 sm:$0xff]   ;;  %v688_v33 = vld [vmem:[#allocation2 + $0xec] ss:$16 sps:$4 sm:$0xff]   ;;  %v669_v34 = vld [vmem:[#allocation2 + $0x120] ss:$16 sps:$4 sm:$0xff]  }
  0x1f   :  { %488 = vmatprep.subr.bf16.mxu1 %v664_v17  ;;  %v690_v35 = vld [vmem:[#allocation2 + $0xe8] ss:$16 sps:$4 sm:$0xff]   ;;  %v826_v36 = vld [vmem:[%s850_s1] sm:$0xff]  ;;  %v694_v38 = vld [vmem:[#allocation2 + $0x10c] ss:$16 sps:$4 sm:$0xff]   ;;  %v102_v4 = vshrl.u32 %v101_v3, 7 }
  0x20   :  { %v673_v37 = vld [vmem:[#allocation2 + $0x144] ss:$16 sps:$4 sm:$0xff]   ;;  %v34_v39 = vpack.c.bf16 %v826_v36, %v826_v36  ;;  %v675_v40 = vld [vmem:[#allocation2 + $0x140] ss:$16 sps:$4 sm:$0xff]   ;;  %v696_v41 = vld [vmem:[#allocation2 + $0x108] ss:$16 sps:$4 sm:$0xff]  }
  0x21   :  { %448 = vmatpush1.bf16.msra.mxu0 %v639_v9  ;;  %v679_v42 = vld [vmem:[#allocation2 + $0x164] ss:$16 sps:$4 sm:$0xff]   ;;  %v700_v43 = vld [vmem:[#allocation2 + $0x12c] ss:$16 sps:$4 sm:$0xff]   ;;  %v681_v44 = vld [vmem:[#allocation2 + $0x160] ss:$16 sps:$4 sm:$0xff]  }
  0x22   :  { %449 = vmatprep.subr.bf16.mxu0 %v640_v12  ;;  %489 = vmatpush1.bf16.msra.mxu1 %v666_v20  ;;  %v702_v45 = vld [vmem:[#allocation2 + $0x128] ss:$16 sps:$4 sm:$0xff]   ;;  %v685_v46 = vld [vmem:[#allocation2 + $0x184] ss:$16 sps:$4 sm:$0xff]   ;;  %v706_v47 = vld [vmem:[#allocation2 + $0x14c] ss:$16 sps:$4 sm:$0xff]  }
  0x23   :  { %490 = vmatprep.subr.bf16.mxu1 %v670_v21  ;;  %473 = vmatprep.mubr.bf16.mxu0 %v34_v39  ;;  %v687_v48 = vld [vmem:[#allocation2 + $0x180] ss:$16 sps:$4 sm:$0xff]   ;;  %v708_v49 = vld [vmem:[#allocation2 + $0x148] ss:$16 sps:$4 sm:$0xff]   ;;  %v691_v50 = vld [vmem:[#allocation2 + $0x1a4] ss:$16 sps:$4 sm:$0xff]  }
  0x24   :  { %514 = vmatprep.mubr.bf16.mxu1 %v34_v39  ;;  %v709_v51 = vld [vmem:[#allocation2 + $0x16c] ss:$16 sps:$4 sm:$0xff]   ;;  %v693_v52 = vld [vmem:[#allocation2 + $0x1a0] ss:$16 sps:$4 sm:$0xff]   ;;  %v711_v53 = vld [vmem:[#allocation2 + $0x168] ss:$16 sps:$4 sm:$0xff]  }
  0x25   :  { %450 = vmatpush1.bf16.msra.mxu0 %v642_v13  ;;  %v697_v54 = vld [vmem:[#allocation2 + $0x1c4] ss:$16 sps:$4 sm:$0xff]   ;;  %v712_v55 = vld [vmem:[#allocation2 + $0x18c] ss:$16 sps:$4 sm:$0xff]   ;;  %v699_v56 = vld [vmem:[#allocation2 + $0x1c0] ss:$16 sps:$4 sm:$0xff]  }
  0x26   :  { %451 = vmatprep.subr.bf16.mxu0 %v643_v15  ;;  %491 = vmatpush1.bf16.msra.mxu1 %v672_v24  ;;  %v714_v57 = vld [vmem:[#allocation2 + $0x188] ss:$16 sps:$4 sm:$0xff]   ;;  %v703_v58 = vld [vmem:[#allocation2 + $0x1e4] ss:$16 sps:$4 sm:$0xff]   ;;  %v715_v59 = vld [vmem:[#allocation2 + $0x1ac] ss:$16 sps:$4 sm:$0xff]  }
  0x27   :  { %492 = vmatprep.subr.bf16.mxu1 %v676_v25  ;;  %v705_v60 = vld [vmem:[#allocation2 + $0x1e0] ss:$16 sps:$4 sm:$0xff]   ;;  %v717_v61 = vld [vmem:[#allocation2 + $0x1a8] ss:$16 sps:$4 sm:$0xff]   ;;  %v718_v62 = vld [vmem:[#allocation2 + $0x1cc] ss:$16 sps:$4 sm:$0xff]  }
  0x28   :  { %v33_v63 = vld [vmem:[%s849_s0] sm:$0xf]  ;;  %v720_v0 = vld [vmem:[#allocation2 + $0x1c8] ss:$16 sps:$4 sm:$0xff]   ;;  %v721_v1 = vld [vmem:[#allocation2 + $0x1ec] ss:$16 sps:$4 sm:$0xff]  }
  0x29   :  { %452 = vmatpush1.bf16.msra.mxu0 %v645_v18  ;;  %v723_v2 = vld [vmem:[#allocation2 + $0x1e8] ss:$16 sps:$4 sm:$0xff]   ;;  %v103_v5 = vsub.s32 0, %v102_v4  ;;  %v99_v6 = vld [vmem:[%s852_s3] sm:$0xf]  ;;  %v107_v7 = vsub.s32 1, %v102_v4 }
  0x2a   :  { %453 = vmatprep.subr.bf16.mxu0 %v649_v19  ;;  %493 = vmatpush1.bf16.msra.mxu1 %v678_v28  ;;  %v115_v24 = vsub.s32 3, %v102_v4  ;;  %v111_v25 = vsub.s32 2, %v102_v4  ;;  %s785_s0 = smov [#allocation5]  }
  0x2b   :  { %494 = vmatprep.subr.bf16.mxu1 %v682_v29  ;;  %v104_v8 = vrot.slane %v99_v6, %v103_v5  ;;  %v108_v10 = vrot.slane %v99_v6, %v107_v7  ;;  %s549_s3 = sshll.u32 %s785_s0, 4  ;;  %s550_s3 = int_to_ptr.vmem [resolvable:$true] %s549_s3 }
  0x2c   :  { %v112_v29 = vrot.slane %v99_v6, %v111_v25  ;;  %s756_s7 = scalar_lea.vmem %s550_s3, 128  ;;  %p761_p9 = scmp.lt.s32.totalorder %s550_s3, %s550_s3 }
  0x2d   :  { %454 = vmatpush1.bf16.msra.mxu0 %v651_v22  ;;  %p757_p8 = scmp.ne.s32.totalorder %s550_s3, %s756_s7  ;;  %p762_p10 = scmp.lt.s32.totalorder %s756_s7, %s756_s7 }
  0x2e   :  { %455 = vmatprep.subr.bf16.mxu0 %v655_v23  ;;  %495 = vmatpush1.bf16.msra.mxu1 %v684_v32 }
  0x2f   :  { %496 = vmatprep.subr.bf16.mxu1 %v688_v33  ;;  %p763_p11 = por %p762_p10, %p761_p9 }
  0x31   :  { %456 = vmatpush1.bf16.msra.mxu0 %v657_v26  ;;  %v116_v26 = vrot.slane %v99_v6, %v115_v24  ;;  %p764_p12 = pnand %p763_p11, %p757_p8 }
  0x32   :  { %457 = vmatprep.subr.bf16.mxu0 %v661_v27  ;;  %497 = vmatpush1.bf16.msra.mxu1 %v690_v35 }
  0x33   :  { %498 = vmatprep.subr.bf16.mxu1 %v694_v38 }
  0x35   :  { %458 = vmatpush1.bf16.msra.mxu0 %v663_v30 }
  0x36   :  { %459 = vmatprep.subr.bf16.mxu0 %v667_v31  ;;  %499 = vmatpush1.bf16.msra.mxu1 %v696_v41 }
  0x37   :  { %500 = vmatprep.subr.bf16.mxu1 %v700_v43 }
  0x39   :  { %460 = vmatpush1.bf16.msra.mxu0 %v669_v34 }
  0x3a   :  { %461 = vmatprep.subr.bf16.mxu0 %v673_v37  ;;  %501 = vmatpush1.bf16.msra.mxu1 %v702_v45 }
  0x3b   :  { %502 = vmatprep.subr.bf16.mxu1 %v706_v47 }
  0x3d   :  { %462 = vmatpush1.bf16.msra.mxu0 %v675_v40 }
  0x3e   :  { %463 = vmatprep.subr.bf16.mxu0 %v679_v42  ;;  %503 = vmatpush1.bf16.msra.mxu1 %v708_v49 }
  0x3f   :  { %504 = vmatprep.subr.bf16.mxu1 %v709_v51 }
  0x41   :  { %464 = vmatpush1.bf16.msra.mxu0 %v681_v44 }
  0x42   :  { %465 = vmatprep.subr.bf16.mxu0 %v685_v46  ;;  %505 = vmatpush1.bf16.msra.mxu1 %v711_v53 }
  0x43   :  { %506 = vmatprep.subr.bf16.mxu1 %v712_v55 }
  0x45   :  { %466 = vmatpush1.bf16.msra.mxu0 %v687_v48 }
  0x46   :  { %467 = vmatprep.subr.bf16.mxu0 %v691_v50  ;;  %507 = vmatpush1.bf16.msra.mxu1 %v714_v57 }
  0x47   :  { %508 = vmatprep.subr.bf16.mxu1 %v715_v59 }
  0x49   :  { %468 = vmatpush1.bf16.msra.mxu0 %v693_v52 }
  0x4a   :  { %469 = vmatprep.subr.bf16.mxu0 %v697_v54  ;;  %509 = vmatpush1.bf16.msra.mxu1 %v717_v61 }
  0x4b   :  { %510 = vmatprep.subr.bf16.mxu1 %v718_v62 }
  0x4d   :  { %470 = vmatpush1.bf16.msra.mxu0 %v699_v56 }
  0x4e   :  { %471 = vmatprep.subr.bf16.mxu0 %v703_v58  ;;  %511 = vmatpush1.bf16.msra.mxu1 %v720_v0 }
  0x4f   :  { %512 = vmatprep.subr.bf16.mxu1 %v721_v1 }
  0x51   :  { %472 = vmatpush1.bf16.msra.mxu0 %v705_v60 }
  0x52   :  { %513 = vmatpush1.bf16.msra.mxu1 %v723_v2 }
  0x54   :  { %474 = vmatmul.mubr.bf16.vlgmr.msra.gmra.mrb[0].mxu0 %v33_v63 }
  0x55   :  { %515 = vmatmul.mubr.bf16.vlgmr.msra.gmra.mrb[0].mxu1 %v33_v63 }
 0x127   :  { %v475_v9 = vpop.f32.mrb[0].mxu0 }
 0x128   :  { %v476_v11 = vadd.f32 %v475_v9, %v104_v8  ;;  %v477_v12 = vpop.f32.mrb[1].mxu0  ;;  %v516_v18 = vpop.f32.mrb[0].mxu1 }
 0x129   :  { %v479_v13 = vpop.f32.mrb[2].mxu0  ;;  %v478_v16 = vadd.f32 %v477_v12, %v108_v10  ;;  %v518_v19 = vpop.f32.mrb[1].mxu1  ;;  %v517_v32 = vadd.f32 %v516_v18, %v112_v29 }
 0x12a   :  { %v622_v14 = vmul.f32 -1.442695, %v476_v11  ;;  %v480_v15 = vpop.f32.mrb[3].mxu0  ;;  %v520_v20 = vpop.f32.mrb[2].mxu1  ;;  %v519_v30 = vadd.f32 %v518_v19, %v116_v26 }
 0x12b   :  { %v623_v17 = vmul.f32 -1.442695, %v478_v16  ;;  %v521_v21 = vpop.f32.mrb[3].mxu1 }
 0x12c   :  { %724 = vpow2.f32 %v622_v14 }
 0x12d   :  { %726 = vpow2.f32 %v623_v17 }
 0x136   :  { %v725_v22 = vpop.eup %724 }
 0x137   :  { %v526_v23 = vadd.f32 1.0, %v725_v22  ;;  %v727_v27 = vpop.eup %726 }
 0x138   :  { %v532_v28 = vadd.f32 1.0, %v727_v27 }
 0x139   :  { %728 = vrcp.f32 %v526_v23 }
 0x13a   :  { %730 = vrcp.f32 %v532_v28 }
 0x143   :  { %v729_v31 = vpop.eup %728 }
 0x144   :  { %v535_v33 = vmul.f32 %v729_v31, %v519_v30  ;;  %v731_v35 = vpop.eup %730 }
 0x145   :  { %v538_v37 = vsub.f32 1.0, %v731_v35  ;;  %v540_v40 = vmul.f32 %v731_v35, %v826_v36 }
 0x146   :  { %v536_v34 = vadd.f32 %v535_v33, %v517_v32 }
 0x148   :  { %732 = vtanh.f32 %v536_v34 }
 0x152   :  { %v733_v38 = vpop.eup %732 }
 0x153   :  { %v539_v39 = vmul.f32 %v733_v38, %v538_v37 }
 0x155   :  { %v541_v41 = vadd.f32 %v540_v40, %v539_v39 }
 0x157   :  { %542 = vst [vmem:[#allocation5] sm:$0xff] %v541_v41 }
 0x158   :  { %767 = shalt.err (!%p764_p12)
}
 0x159   :  { %s768_s10 = scalar_lea.hbm %s853_s4, 128 }
 0x15a   :  { %p769_p13 = scmp.ne.s32.totalorder %s853_s4, %s768_s10  ;;  %p772_p0 = scmp.lt.u32.totalorder %s768_s10, %s853_s4 }
 0x15c   :  { %p774_p1 = pnand %p772_p0, %p769_p13 }
 0x15e   :  { %777 = shalt.err (!%p774_p1)
}
 0x15f   :  { %552 = dma.vmem_to_hbm [thread:$0]  %s550_s3, 128, %s853_s4, [#allocation4]  }
 0x160   :  { %780 = dma.done.wait [#allocation4], 128  }
 0x161   :  { %781 = vsyncadd [#allocation4], 4294967168 }
 0x162   :  { %556 = vsyncpa [#allocation3], 1 }
 0x163   :  { %557 = vsyncpa [#allocation4], 1 }

</bundles_post_ra>
